<compile_context>
chip_gen: v7x
topology: tpu7x:2x2x1
jax: 0.10.0
libtpu: 0.0.40
codegen_flags: <defaults>
</compile_context>

<pallas_src>
import functools

import numpy as np
import jax
import jax.numpy as jnp
from jax.experimental import pallas as pl
from jax.experimental.pallas import tpu as pltpu


_LAYER1 = ("branch1x1", "branch3x3_1", "branch3x3dbl_1")   # C   -> C/2, all 1x1
_LAYER2 = ("branch1x1_1", "branch3x3_2", "branch3x3dbl_2") # C/2 -> C, k=1/3/5


# ----------------------------------------------------------------------------
# Fused kernel: 2 fused conv layers (6 BasicConv2d stages) + channel concat
# ----------------------------------------------------------------------------
def _multi_branch_kernel(x_ref, w1_ref, b1_ref, w2_ref, b2_ref, o_ref,
                         hp_ref, *, H, P):
    """x_ref:  (N*H, W*C)     f32 activations, lanes = (w, c) channel-fastest.
    w1_ref: (W*C, 3*W*C/2)  bf16 fused layer-1 banded weights (BN folded).
    b1_ref: (1, 3*W*C/2)    f32 fused layer-1 bias (per-pixel tiled).
    w2_ref: (K, 3*W*C/2, 3*W*C) bf16 block-diagonal fused layer-2 band (K=5).
    b2_ref: (1, 3*W*C)      f32 fused layer-2 bias.
    o_ref:  (N*H, 4*W*C)    output, lanes = [y1 | y3 | y5 | x] branch-major.
    hp_ref: (N*(H+2P), 3*W*C/2) f32 scratch: shared row-halo buffer."""
    NH = x_ref.shape[0]
    N = NH // H
    K = w2_ref.shape[0]
    Wout = w2_ref.shape[2]                    # 3 * W * C (fused branch lanes)
    R = (N - 1) * (H + 2 * P) + H             # accumulator rows (incl. gaps)

    x = x_ref[...]                            # (N*H, W*C) f32

    # ---- layer 1: three fused 1x1 convs (+BN+ReLU), batch stacked -> 1 push
    h = jnp.dot(x.astype(jnp.bfloat16), w1_ref[...],
                preferred_element_type=jnp.float32)
    h = jnp.maximum(h + b1_ref[...], 0.0)     # (N*H, 96) f32

    # ---- shared row halo: [zP; h_0; z2P; h_1; z2P; ...; h_{N-1}; zP] -------
    hp_ref[...] = jnp.zeros_like(hp_ref)
    for n in range(N):                        # static, tiny N
        r0 = n * (H + 2 * P) + P
        hp_ref[r0:r0 + H, :] = h[n * H:(n + 1) * H, :]

    # ---- layer 2: fused block-diagonal banded conv, K tap-matmuls ----------
    acc = jnp.dot(hp_ref[0:R, :].astype(jnp.bfloat16), w2_ref[0],
                  preferred_element_type=jnp.float32)
    for kh in range(1, K):
        acc = acc + jnp.dot(hp_ref[kh:kh + R, :].astype(jnp.bfloat16),
                            w2_ref[kh],
                            preferred_element_type=jnp.float32)
    y = jnp.maximum(acc + b2_ref[...], 0.0)   # (R, 192) f32, fused BN + ReLU

    # ---- store branch outputs + identity branch directly (lane slices) -----
    for n in range(N):
        o_ref[n * H:(n + 1) * H, 0:Wout] = (
            y[n * (H + 2 * P):n * (H + 2 * P) + H, :].astype(o_ref.dtype))
    o_ref[:, Wout:o_ref.shape[1]] = x.astype(o_ref.dtype)


# ----------------------------------------------------------------------------
# Parameter preparation (host-side, once): fold BN, build fused band weights.
# ----------------------------------------------------------------------------
def _fold_bn(p, eps=1e-3):
    w = np.asarray(p["w"], dtype=np.float32)            # (K, K, Cin, Cout) HWIO
    scale = np.asarray(p["gamma"], np.float32) / np.sqrt(
        np.asarray(p["var"], np.float32) + eps)
    bias = np.asarray(p["beta"], np.float32) - np.asarray(p["mean"], np.float32) * scale
    return w * scale[None, None, None, :], bias.astype(np.float32)


def _band_weight(w, W):
    """(K,K,Cin,Cout) HWIO -> (K, W*Cin, W*Cout) banded matmul weights.

    band[kh][jp*Cin+ci, j*Cout+co] = w[kh, jp-j+p, ci, co] (0 if tap off-band).
    W-direction zero padding of the conv is implicit (dropped taps).
    Assumes stride 1, odd K, 'same' padding p=(K-1)//2."""
    K, _, Cin, Cout = w.shape
    p = (K - 1) // 2
    band = np.zeros((K, W, Cin, W, Cout), dtype=np.float32)
    for kh in range(K):
        for kw in range(K):
            d = kw - p
            j = np.arange(max(0, -d), min(W, W - d))
            band[kh, j + d, :, j, :] = w[kh, kw]
    return band.reshape(K, W * Cin, W * Cout)


def prepare_multi_branch_fused(params, W):
    """Returns (w1, b1, w2, b2): cross-branch fused, BN-folded, bf16 weights."""
    # Layer 1: three 1x1 convs share the input -> concat bands along outputs.
    w1_blocks, b1_blocks = [], []
    for name in _LAYER1:
        wf, bf = _fold_bn(params[name])
        w1_blocks.append(_band_weight(wf, W)[0])        # (W*Cin, W*Ch)
        b1_blocks.append(np.tile(bf, W))
    w1 = np.concatenate(w1_blocks, axis=1)              # (W*Cin, 3*W*Ch)
    b1 = np.concatenate(b1_blocks)[None, :]             # (1, 3*W*Ch)

    # Layer 2: block-diagonal fused band over the max tap count (K=5).
    bands, biases = [], []
    for name in _LAYER2:
        wf, bf = _fold_bn(params[name])
        bands.append(_band_weight(wf, W))
        biases.append(np.tile(bf, W))
    K = max(b.shape[0] for b in bands)
    P = (K - 1) // 2
    in_w = sum(b.shape[1] for b in bands)
    out_w = sum(b.shape[2] for b in bands)
    w2 = np.zeros((K, in_w, out_w), np.float32)
    ro = co = 0
    for band in bands:
        k, wi, wo = band.shape
        off = P - (k - 1) // 2                           # centre-align taps
        w2[off:off + k, ro:ro + wi, co:co + wo] = band
        ro += wi
        co += wo
    b2 = np.concatenate(biases)[None, :]                 # (1, 3*W*Cout)

    return (jnp.asarray(w1, jnp.bfloat16), jnp.asarray(b1, jnp.float32),
            jnp.asarray(w2, jnp.bfloat16), jnp.asarray(b2, jnp.float32))


# ----------------------------------------------------------------------------
# Forward pass (single pallas_call, single grid step)
# ----------------------------------------------------------------------------
@jax.jit
def multi_branch_forward(x_nchw, w1, b1, w2, b2):
    N, C, H, W = x_nchw.shape
    K = w2.shape[0]
    P = (K - 1) // 2
    NH = N * H
    lanes_out = 4 * W * C                                # 3 branches + identity

    # NCHW -> (N*H, W*C): batch/height stacked on sublanes, (w, c) on lanes.
    x2 = jnp.transpose(x_nchw, (0, 2, 3, 1)).reshape(NH, W * C)

    kernel = functools.partial(_multi_branch_kernel, H=H, P=P)
    out = pl.pallas_call(
        kernel,
        out_shape=jax.ShapeDtypeStruct((NH, lanes_out), x_nchw.dtype),
        grid=(1,),                                       # batch handled in-kernel
        in_specs=[
            pl.BlockSpec((NH, W * C), lambda i: (0, 0)),
            pl.BlockSpec(w1.shape, lambda i: (0, 0)),
            pl.BlockSpec(b1.shape, lambda i: (0, 0)),
            pl.BlockSpec(w2.shape, lambda i: (0, 0, 0)),
            pl.BlockSpec(b2.shape, lambda i: (0, 0)),
        ],
        out_specs=pl.BlockSpec((NH, lanes_out), lambda i: (0, 0)),
        scratch_shapes=[pltpu.VMEM((N * (H + 2 * P), w2.shape[1]), jnp.float32)],
        compiler_params=pltpu.CompilerParams(
            dimension_semantics=("arbitrary",)),
    )(x2, w1, b1, w2, b2)

    # (N*H, [branch, w, c]) -> NCHW with channel order [b1, b3, b5, x].
    return (out.reshape(N, H, 4, W, C)
               .transpose(0, 2, 4, 1, 3)
               .reshape(N, 4 * C, H, W))


# ----------------------------------------------------------------------------
# Synthetic parameters (same structure as the PyTorch module)
# ----------------------------------------------------------------------------
def init_basic_conv2d_params(key, cin, cout, k):
    kw_key, kg_key, kb_key = jax.random.split(key, 3)
    w = 0.1 * jax.random.normal(kw_key, (k, k, cin, cout), dtype=jnp.float32)  # HWIO
    gamma = 1.0 + 0.1 * jax.random.normal(kg_key, (cout,), dtype=jnp.float32)
    beta = 0.1 * jax.random.normal(kb_key, (cout,), dtype=jnp.float32)
    return dict(w=w, gamma=gamma, beta=beta,
                mean=jnp.zeros((cout,), jnp.float32),   # PyTorch default running stats
                var=jnp.ones((cout,), jnp.float32))


def init_multi_branch_params(key, in_channels):
    c, h = in_channels, in_channels // 2
    ks = jax.random.split(key, 6)
    return dict(
        branch1x1=init_basic_conv2d_params(ks[0], c, h, 1),
        branch1x1_1=init_basic_conv2d_params(ks[1], h, c, 1),
        branch3x3_1=init_basic_conv2d_params(ks[2], c, h, 1),
        branch3x3_2=init_basic_conv2d_params(ks[3], h, c, 3),
        branch3x3dbl_1=init_basic_conv2d_params(ks[4], c, h, 1),
        branch3x3dbl_2=init_basic_conv2d_params(ks[5], h, c, 5),
    )


# ----------------------------------------------------------------------------
# Pure-JAX reference (for a light correctness check)
# ----------------------------------------------------------------------------
def _ref_basic(x_nhwc, p, padding, eps=1e-3):
    y = jax.lax.conv_general_dilated(
        x_nhwc, p["w"], (1, 1), [(padding, padding), (padding, padding)],
        dimension_numbers=("NHWC", "HWIO", "NHWC"),
        precision=jax.lax.Precision.HIGHEST)
    scale = p["gamma"] / jnp.sqrt(p["var"] + eps)
    return jnp.maximum(y * scale + (p["beta"] - p["mean"] * scale), 0.0)


def _ref_forward(x_nchw, params):
    x = jnp.transpose(x_nchw, (0, 2, 3, 1))
    b1 = _ref_basic(_ref_basic(x, params["branch1x1"], 0), params["branch1x1_1"], 0)
    b3 = _ref_basic(_ref_basic(x, params["branch3x3_1"], 0), params["branch3x3_2"], 1)
    b5 = _ref_basic(_ref_basic(x, params["branch3x3dbl_1"], 0), params["branch3x3dbl_2"], 2)
    out = jnp.concatenate([b1, b3, b5, x], axis=-1)
    return jnp.transpose(out, (0, 3, 1, 2))


if __name__ == "__main__":
    key = jax.random.PRNGKey(0)
    k_x, k_p = jax.random.split(key)

    N, C, H, W = 2, 4, 16, 16
    x = jax.random.normal(k_x, (N, C, H, W), dtype=jnp.float32)      # NCHW input
    params = init_multi_branch_params(k_p, C)
    w1, b1, w2, b2 = prepare_multi_branch_fused(params, W)

    out = jax.block_until_ready(multi_branch_forward(x, w1, b1, w2, b2))

    assert out.shape == (N, 4 * C, H, W), out.shape
    assert bool(jnp.all(jnp.isfinite(out)))

    # Tolerance covers the intentional bf16 MXU operands (f32 accumulation)
    # vs the f32 Precision.HIGHEST reference conv, while still catching any
    # indexing / band-layout bug (those produce O(0.1+) errors).
    ref = _ref_forward(x, params)
    err = float(jnp.max(jnp.abs(out - ref)))
    assert err < 5e-2, f"max abs diff vs reference = {err}"

    print("KERNEL_OK")
</pallas_src>

<mosaic_0001>
module attributes {stable_mosaic.version = 11 : i64} {
  func.func @_multi_branch_kernel(%arg0: i32, %arg1: memref<32x64xf32, #tpu.memory_space<vmem>>, %arg2: memref<64x96xbf16, #tpu.memory_space<vmem>>, %arg3: memref<1x96xf32, #tpu.memory_space<vmem>>, %arg4: memref<5x96x192xbf16, #tpu.memory_space<vmem>>, %arg5: memref<1x192xf32, #tpu.memory_space<vmem>>, %arg6: memref<32x256xf32, #tpu.memory_space<vmem>>, %arg7: memref<40x96xf32, #tpu.memory_space<vmem>>) attributes {dimension_semantics = [#tpu.dimension_semantics<arbitrary>], iteration_bounds = array<i64: 1>, scalar_prefetch = 0 : i64, scratch_operands = 1 : i64, tpu.core_type = #tpu.core_type<tc>, window_params = [{pipeline_mode = #tpu.pipeline_mode<synchronous>, transform_indices = @transform_0, window_bounds = array<i64: 32, 64>}, {pipeline_mode = #tpu.pipeline_mode<synchronous>, transform_indices = @transform_1, window_bounds = array<i64: 64, 96>}, {pipeline_mode = #tpu.pipeline_mode<synchronous>, transform_indices = @transform_2, window_bounds = array<i64: 1, 96>}, {pipeline_mode = #tpu.pipeline_mode<synchronous>, transform_indices = @transform_3, window_bounds = array<i64: 5, 96, 192>}, {pipeline_mode = #tpu.pipeline_mode<synchronous>, transform_indices = @transform_4, window_bounds = array<i64: 1, 192>}, {pipeline_mode = #tpu.pipeline_mode<synchronous>, transform_indices = @transform_5, window_bounds = array<i64: 32, 256>}]} {
    %c0 = arith.constant 0 : index
    %c0_0 = arith.constant 0 : index
    %0 = vector.load %arg1[%c0, %c0_0] : memref<32x64xf32, #tpu.memory_space<vmem>>, vector<32x64xf32>
    %1 = arith.truncf %0 : vector<32x64xf32> to vector<32x64xbf16>
    %c0_1 = arith.constant 0 : index
    %c0_2 = arith.constant 0 : index
    %2 = vector.load %arg2[%c0_1, %c0_2] : memref<64x96xbf16, #tpu.memory_space<vmem>>, vector<64x96xbf16>
    %cst = arith.constant dense<0.000000e+00> : vector<32x96xf32>
    %3 = tpu.matmul %1, %2, %cst {dimension_numbers = #tpu.dot_dimension_numbers<[1], [0], [0], [1], [0, 0, 1, 1], [], []>} : vector<32x64xbf16>, vector<64x96xbf16>, vector<32x96xf32> -> vector<32x96xf32>
    %c0_3 = arith.constant 0 : index
    %c0_4 = arith.constant 0 : index
    %4 = vector.load %arg3[%c0_3, %c0_4] : memref<1x96xf32, #tpu.memory_space<vmem>>, vector<1x96xf32>
    %5 = vector.broadcast %4 : vector<1x96xf32> to vector<32x96xf32>
    %6 = arith.addf %3, %5 : vector<32x96xf32>
    %cst_5 = arith.constant 0.000000e+00 : f32
    %7 = vector.broadcast %cst_5 : f32 to vector<32x96xf32>
    %8 = arith.maximumf %6, %7 : vector<32x96xf32>
    %cst_6 = arith.constant 0.000000e+00 : f32
    %9 = vector.broadcast %cst_6 : f32 to vector<40x96xf32>
    %c0_7 = arith.constant 0 : index
    %c0_8 = arith.constant 0 : index
    %10 = vector.load %arg7[%c0_7, %c0_8] : memref<40x96xf32, #tpu.memory_space<vmem>>, vector<40x96xf32>
    tpu.vector_store %arg7[%c0_7, %c0_8], %9 {strides = array<i32>} : memref<40x96xf32, #tpu.memory_space<vmem>>, vector<40x96xf32>,
    %11 = vector.extract_strided_slice %8 {offsets = [0, 0], sizes = [16, 96], strides = [1, 1]} : vector<32x96xf32> to vector<16x96xf32>
    %c2 = arith.constant 2 : index
    %c0_9 = arith.constant 0 : index
    %12 = vector.load %arg7[%c2, %c0_9] : memref<40x96xf32, #tpu.memory_space<vmem>>, vector<16x96xf32>
    tpu.vector_store %arg7[%c2, %c0_9], %11 {strides = array<i32>} : memref<40x96xf32, #tpu.memory_space<vmem>>, vector<16x96xf32>,
    %13 = vector.extract_strided_slice %8 {offsets = [16, 0], sizes = [16, 96], strides = [1, 1]} : vector<32x96xf32> to vector<16x96xf32>
    %c22 = arith.constant 22 : index
    %c0_10 = arith.constant 0 : index
    %14 = vector.load %arg7[%c22, %c0_10] : memref<40x96xf32, #tpu.memory_space<vmem>>, vector<16x96xf32>
    tpu.vector_store %arg7[%c22, %c0_10], %13 {strides = array<i32>} : memref<40x96xf32, #tpu.memory_space<vmem>>, vector<16x96xf32>,
    %c0_11 = arith.constant 0 : index
    %c0_12 = arith.constant 0 : index
    %15 = vector.load %arg7[%c0_11, %c0_12] : memref<40x96xf32, #tpu.memory_space<vmem>>, vector<36x96xf32>
    %16 = arith.truncf %15 : vector<36x96xf32> to vector<36x96xbf16>
    %c0_13 = arith.constant 0 : index
    %c0_14 = arith.constant 0 : index
    %c0_15 = arith.constant 0 : index
    %17 = vector.load %arg4[%c0_13, %c0_14, %c0_15] : memref<5x96x192xbf16, #tpu.memory_space<vmem>>, vector<1x96x192xbf16>
    %18 = vector.shape_cast %17 : vector<1x96x192xbf16> to vector<96x192xbf16>
    %cst_16 = arith.constant dense<0.000000e+00> : vector<36x192xf32>
    %19 = tpu.matmul %16, %18, %cst_16 {dimension_numbers = #tpu.dot_dimension_numbers<[1], [0], [0], [1], [0, 0, 1, 1], [], []>} : vector<36x96xbf16>, vector<96x192xbf16>, vector<36x192xf32> -> vector<36x192xf32>
    %c1 = arith.constant 1 : index
    %c0_17 = arith.constant 0 : index
    %20 = vector.load %arg7[%c1, %c0_17] : memref<40x96xf32, #tpu.memory_space<vmem>>, vector<36x96xf32>
    %21 = arith.truncf %20 : vector<36x96xf32> to vector<36x96xbf16>
    %c1_18 = arith.constant 1 : index
    %c0_19 = arith.constant 0 : index
    %c0_20 = arith.constant 0 : index
    %22 = vector.load %arg4[%c1_18, %c0_19, %c0_20] : memref<5x96x192xbf16, #tpu.memory_space<vmem>>, vector<1x96x192xbf16>
    %23 = vector.shape_cast %22 : vector<1x96x192xbf16> to vector<96x192xbf16>
    %cst_21 = arith.constant dense<0.000000e+00> : vector<36x192xf32>
    %24 = tpu.matmul %21, %23, %cst_21 {dimension_numbers = #tpu.dot_dimension_numbers<[1], [0], [0], [1], [0, 0, 1, 1], [], []>} : vector<36x96xbf16>, vector<96x192xbf16>, vector<36x192xf32> -> vector<36x192xf32>
    %25 = arith.addf %19, %24 : vector<36x192xf32>
    %c2_22 = arith.constant 2 : index
    %c0_23 = arith.constant 0 : index
    %26 = vector.load %arg7[%c2_22, %c0_23] : memref<40x96xf32, #tpu.memory_space<vmem>>, vector<36x96xf32>
    %27 = arith.truncf %26 : vector<36x96xf32> to vector<36x96xbf16>
    %c2_24 = arith.constant 2 : index
    %c0_25 = arith.constant 0 : index
    %c0_26 = arith.constant 0 : index
    %28 = vector.load %arg4[%c2_24, %c0_25, %c0_26] : memref<5x96x192xbf16, #tpu.memory_space<vmem>>, vector<1x96x192xbf16>
    %29 = vector.shape_cast %28 : vector<1x96x192xbf16> to vector<96x192xbf16>
    %cst_27 = arith.constant dense<0.000000e+00> : vector<36x192xf32>
    %30 = tpu.matmul %27, %29, %cst_27 {dimension_numbers = #tpu.dot_dimension_numbers<[1], [0], [0], [1], [0, 0, 1, 1], [], []>} : vector<36x96xbf16>, vector<96x192xbf16>, vector<36x192xf32> -> vector<36x192xf32>
    %31 = arith.addf %25, %30 : vector<36x192xf32>
    %c3 = arith.constant 3 : index
    %c0_28 = arith.constant 0 : index
    %32 = vector.load %arg7[%c3, %c0_28] : memref<40x96xf32, #tpu.memory_space<vmem>>, vector<36x96xf32>
    %33 = arith.truncf %32 : vector<36x96xf32> to vector<36x96xbf16>
    %c3_29 = arith.constant 3 : index
    %c0_30 = arith.constant 0 : index
    %c0_31 = arith.constant 0 : index
    %34 = vector.load %arg4[%c3_29, %c0_30, %c0_31] : memref<5x96x192xbf16, #tpu.memory_space<vmem>>, vector<1x96x192xbf16>
    %35 = vector.shape_cast %34 : vector<1x96x192xbf16> to vector<96x192xbf16>
    %cst_32 = arith.constant dense<0.000000e+00> : vector<36x192xf32>
    %36 = tpu.matmul %33, %35, %cst_32 {dimension_numbers = #tpu.dot_dimension_numbers<[1], [0], [0], [1], [0, 0, 1, 1], [], []>} : vector<36x96xbf16>, vector<96x192xbf16>, vector<36x192xf32> -> vector<36x192xf32>
    %37 = arith.addf %31, %36 : vector<36x192xf32>
    %c4 = arith.constant 4 : index
    %c0_33 = arith.constant 0 : index
    %38 = vector.load %arg7[%c4, %c0_33] : memref<40x96xf32, #tpu.memory_space<vmem>>, vector<36x96xf32>
    %39 = arith.truncf %38 : vector<36x96xf32> to vector<36x96xbf16>
    %c4_34 = arith.constant 4 : index
    %c0_35 = arith.constant 0 : index
    %c0_36 = arith.constant 0 : index
    %40 = vector.load %arg4[%c4_34, %c0_35, %c0_36] : memref<5x96x192xbf16, #tpu.memory_space<vmem>>, vector<1x96x192xbf16>
    %41 = vector.shape_cast %40 : vector<1x96x192xbf16> to vector<96x192xbf16>
    %cst_37 = arith.constant dense<0.000000e+00> : vector<36x192xf32>
    %42 = tpu.matmul %39, %41, %cst_37 {dimension_numbers = #tpu.dot_dimension_numbers<[1], [0], [0], [1], [0, 0, 1, 1], [], []>} : vector<36x96xbf16>, vector<96x192xbf16>, vector<36x192xf32> -> vector<36x192xf32>
    %43 = arith.addf %37, %42 : vector<36x192xf32>
    %c0_38 = arith.constant 0 : index
    %c0_39 = arith.constant 0 : index
    %44 = vector.load %arg5[%c0_38, %c0_39] : memref<1x192xf32, #tpu.memory_space<vmem>>, vector<1x192xf32>
    %45 = vector.broadcast %44 : vector<1x192xf32> to vector<36x192xf32>
    %46 = arith.addf %43, %45 : vector<36x192xf32>
    %cst_40 = arith.constant 0.000000e+00 : f32
    %47 = vector.broadcast %cst_40 : f32 to vector<36x192xf32>
    %48 = arith.maximumf %46, %47 : vector<36x192xf32>
    %49 = vector.extract_strided_slice %48 {offsets = [0, 0], sizes = [16, 192], strides = [1, 1]} : vector<36x192xf32> to vector<16x192xf32>
    %c0_41 = arith.constant 0 : index
    %c0_42 = arith.constant 0 : index
    %50 = vector.load %arg6[%c0_41, %c0_42] : memref<32x256xf32, #tpu.memory_space<vmem>>, vector<16x192xf32>
    tpu.vector_store %arg6[%c0_41, %c0_42], %49 {strides = array<i32>} : memref<32x256xf32, #tpu.memory_space<vmem>>, vector<16x192xf32>,
    %51 = vector.extract_strided_slice %48 {offsets = [20, 0], sizes = [16, 192], strides = [1, 1]} : vector<36x192xf32> to vector<16x192xf32>
    %c16 = arith.constant 16 : index
    %c0_43 = arith.constant 0 : index
    %52 = vector.load %arg6[%c16, %c0_43] : memref<32x256xf32, #tpu.memory_space<vmem>>, vector<16x192xf32>
    tpu.vector_store %arg6[%c16, %c0_43], %51 {strides = array<i32>} : memref<32x256xf32, #tpu.memory_space<vmem>>, vector<16x192xf32>,
    %c0_44 = arith.constant 0 : index
    %c192 = arith.constant 192 : index
    %53 = vector.load %arg6[%c0_44, %c192] : memref<32x256xf32, #tpu.memory_space<vmem>>, vector<32x64xf32>
    tpu.vector_store %arg6[%c0_44, %c192], %0 {strides = array<i32>} : memref<32x256xf32, #tpu.memory_space<vmem>>, vector<32x64xf32>,
    return
  }
  func.func @transform_0(%arg0: i32) -> (i32, i32) {
    %c0_i32 = arith.constant 0 : i32
    %c0_i32_0 = arith.constant 0 : i32
    %c0_i32_1 = arith.constant 0 : i32
    return %c0_i32, %c0_i32_0 : i32, i32
  }
  func.func @transform_1(%arg0: i32) -> (i32, i32) {
    %c0_i32 = arith.constant 0 : i32
    %c0_i32_0 = arith.constant 0 : i32
    %c0_i32_1 = arith.constant 0 : i32
    return %c0_i32, %c0_i32_0 : i32, i32
  }
  func.func @transform_2(%arg0: i32) -> (i32, i32) {
    %c0_i32 = arith.constant 0 : i32
    %c0_i32_0 = arith.constant 0 : i32
    %c0_i32_1 = arith.constant 0 : i32
    return %c0_i32, %c0_i32_0 : i32, i32
  }
  func.func @transform_3(%arg0: i32) -> (i32, i32, i32) {
    %c0_i32 = arith.constant 0 : i32
    %c0_i32_0 = arith.constant 0 : i32
    %c0_i32_1 = arith.constant 0 : i32
    %c0_i32_2 = arith.constant 0 : i32
    return %c0_i32, %c0_i32_0, %c0_i32_1 : i32, i32, i32
  }
  func.func @transform_4(%arg0: i32) -> (i32, i32) {
    %c0_i32 = arith.constant 0 : i32
    %c0_i32_0 = arith.constant 0 : i32
    %c0_i32_1 = arith.constant 0 : i32
    return %c0_i32, %c0_i32_0 : i32, i32
  }
  func.func @transform_5(%arg0: i32) -> (i32, i32) {
    %c0_i32 = arith.constant 0 : i32
    %c0_i32_0 = arith.constant 0 : i32
    %c0_i32_1 = arith.constant 0 : i32
    return %c0_i32, %c0_i32_0 : i32, i32
  }
}

</mosaic_0001>

<bundles_post_ra>
// kernel: multi_branch_forward.1
= control target key start
LH: loop header
LB: loop body
LE: loop exit
PB: predicated region body
PF: predicated region fallthrough
CT: control target
= control target key end

     0   :  { %vm66_vm0 = vcmask 523264   ;;  %vm126_vm1 = vcmask 785408   ;;  %v1282_v24 = vmov 0.0   ;;  %v1283_v35 = vmov 0   ;;  %s1284_s9 = smov 64   ;;  %s1633_s1 = inlined_call_operand.vmem [shape: bf16[64,96], index: 1, kind: input, shape index: {}]   ;;  %s1634_s0 = inlined_call_operand.vmem [shape: f32[32,64], index: 0, kind: input, shape index: {}]   ;;  %s1635_s3 = inlined_call_operand.vmem [shape: bf16[5,96,192], index: 3, kind: input, shape index: {}]   ;;  %s1636_s2 = inlined_call_operand.vmem [shape: f32[1,96], index: 2, kind: input, shape index: {}]   ;;  %s1637_s4 = inlined_call_operand.vmem [shape: f32[1,192], index: 4, kind: input, shape index: {}]   ;;  %s1638_s5 = inlined_call_operand.vmem [shape: f32[32,256], index: 5, kind: output, shape index: {}]  }
   0x1   :  { %v1189_v0 = vld [vmem:[%s1633_s1] sm:$0xff]   ;;  %v1190_v1 = vld [vmem:[%s1633_s1 + $0x8] sm:$0xff]   ;;  %v1191_v2 = vld [vmem:[%s1633_s1 + $0x10] sm:$0xff]   ;;  %129 = vst.msk [vmem:[#allocation2 + $0x10] sm:$0xff] %vm126_vm1, %v1282_v24  ;;  %559 = vmatprep.mubr.bf16.mxu1 %v1283_v35  ;;  %vm997_vm2 = vcmask 1048064   ;;  %vm962_vm3 = vcmask 1043456  }
   0x2   :  { %1142 = vmatprep.subr.bf16.mxu0 %v1189_v0  ;;  %v1327_v3 = vld [vmem:[%s1634_s0] sm:$0xff]  ;;  %v1332_v4 = vld [vmem:[%s1634_s0 + $0x8] sm:$0xff]  ;;  %v1192_v7 = vld [vmem:[%s1633_s1 + $0x18] sm:$0xff]   ;;  %130 = vst.msk [vmem:[#allocation2 + $0x18] sm:$0xff] %vm126_vm1, %v1282_v24 }
   0x3   :  { %1143 = vmatpush3.bf16.msra.mxu0 %v1189_v0  ;;  %v25_v5 = vpack.c.bf16 %v1332_v4, %v1327_v3  ;;  %v1193_v6 = vld [vmem:[%s1635_s3 + $0xc4] ss:$8 sps:$4 sm:$0xff]   ;;  %v1198_v8 = vld [vmem:[%s1635_s3 + $0xc0] ss:$8 sps:$4 sm:$0xff]   ;;  %v1199_v9 = vld [vmem:[%s1635_s3 + $0xd4] ss:$8 sps:$4 sm:$0xff]   ;;  %985 = vrot.lane.b32.xlu0 %v1327_v3, %s1284_s9 }
   0x4   :  { %1144 = vmatprep.subr.bf16.mxu0 %v1190_v1  ;;  %527 = vmatprep.subr.bf16.mxu1 %v1193_v6  ;;  %v1352_v10 = vld [vmem:[%s1634_s0 + $0x10] sm:$0xff]  ;;  %v1357_v11 = vld [vmem:[%s1634_s0 + $0x18] sm:$0xff]  ;;  %v1197_v12 = vld [vmem:[%s1635_s3 + $0x64] ss:$8 sps:$4 sm:$0xff]   ;;  %127 = vst.msk [vmem:[#allocation2] sm:$0xff] %vm126_vm1, %v1282_v24 }
   0x5   :  { %1150 = vmatprep.mubr.msk.bf16.mxu0 %vm66_vm0, %v25_v5  ;;  %528 = vmatpush1.bf16.msra.mxu1 %v1198_v8  ;;  %v1204_v13 = vld [vmem:[%s1635_s3 + $0xd0] ss:$8 sps:$4 sm:$0xff]   ;;  %v1195_v14 = vld [vmem:[%s1635_s3 + $0x60] ss:$8 sps:$4 sm:$0xff]   ;;  %v26_v15 = vpack.c.bf16 %v1357_v11, %v1352_v10  ;;  %v1203_v16 = vld [vmem:[%s1635_s3 + $0x74] ss:$8 sps:$4 sm:$0xff]  }
   0x6   :  { %529 = vmatprep.subr.bf16.mxu1 %v1199_v9  ;;  %v1201_v17 = vld [vmem:[%s1635_s3 + $0x70] ss:$8 sps:$4 sm:$0xff]   ;;  %v1059_v18 = vld [vmem:[%s1635_s3 + $0xe0] sm:$0xff]  ;;  %v1060_v19 = vld [vmem:[%s1635_s3 + $0xe8] sm:$0xff]  ;;  %128 = vst.msk [vmem:[#allocation2 + $0x8] sm:$0xff] %vm126_vm1, %v1282_v24  ;;  %989 = vrot.lane.b32.xlu1 %v1352_v10, %s1284_s9 }
   0x7   :  { %1145 = vmatpush3.bf16.msra.mxu0 %v1190_v1  ;;  %v1205_v20 = vld [vmem:[%s1635_s3 + $0xe4] ss:$8 sps:$4 sm:$0xff]   ;;  %v1207_v21 = vld [vmem:[%s1635_s3 + $0x80] ss:$8 sps:$4 sm:$0xff]   ;;  %v1071_v23 = vcombine.low %v1059_v18, %v1060_v19  ;;  %131 = vst.msk [vmem:[#allocation2 + $0x20] sm:$0xff] %vm126_vm1, %v1282_v24  ;;  %987 = vrot.lane.b32.xlu0 %v1332_v4, %s1284_s9 }
   0x8   :  { %1146 = vmatprep.subr.bf16.mxu0 %v1191_v2  ;;  %v1209_v22 = vld [vmem:[%s1635_s3 + $0x84] ss:$8 sps:$4 sm:$0xff]   ;;  %v1210_v25 = vld [vmem:[%s1635_s3 + $0xf4] ss:$8 sps:$4 sm:$0xff]   ;;  %v1212_v27 = vld [vmem:[%s1635_s3 + $0x90] ss:$8 sps:$4 sm:$0xff]  }
   0x9   :  { %530 = vmatpush1.bf16.msra.mxu1 %v1204_v13  ;;  %v1214_v26 = vld [vmem:[%s1635_s3 + $0x94] ss:$8 sps:$4 sm:$0xff]   ;;  %v1215_v28 = vld [vmem:[%s1635_s3 + $0xf0] ss:$8 sps:$4 sm:$0xff]   ;;  %v1216_v29 = vld [vmem:[%s1635_s3 + $0x104] ss:$8 sps:$4 sm:$0xff]  }
   0xa   :  { %531 = vmatprep.subr.bf16.mxu1 %v1205_v20  ;;  %v1218_v30 = vld [vmem:[%s1635_s3 + $0xa0] ss:$8 sps:$4 sm:$0xff]   ;;  %v1220_v31 = vld [vmem:[%s1635_s3 + $0xa4] ss:$8 sps:$4 sm:$0xff]   ;;  %v1222_v33 = vld [vmem:[%s1635_s3 + $0x114] ss:$8 sps:$4 sm:$0xff]   ;;  %991 = vrot.lane.b32.xlu1 %v1357_v11, %s1284_s9 }
   0xb   :  { %1147 = vmatpush3.bf16.msra.mxu0 %v1191_v2  ;;  %v1221_v32 = vld [vmem:[%s1635_s3 + $0x100] ss:$8 sps:$4 sm:$0xff]   ;;  %v1226_v34 = vld [vmem:[%s1635_s3 + $0xb4] ss:$8 sps:$4 sm:$0xff]   ;;  %v1224_v36 = vld [vmem:[%s1635_s3 + $0xb0] ss:$8 sps:$4 sm:$0xff]  }
   0xc   :  { %1148 = vmatprep.subr.bf16.mxu0 %v1192_v7  ;;  %v1227_v37 = vld [vmem:[%s1635_s3 + $0x110] ss:$8 sps:$4 sm:$0xff]   ;;  %v1230_v38 = vld [vmem:[%s1635_s3 + $0x124] ss:$8 sps:$4 sm:$0xff]   ;;  %v1006_v40 = vld [vmem:[%s1636_s2] ss:$0 sm:$0xff] }
   0xd   :  { %532 = vmatpush1.bf16.msra.mxu1 %v1071_v23  ;;  %v1233_v39 = vld [vmem:[%s1635_s3 + $0x4] ss:$8 sps:$4 sm:$0xff]   ;;  %v1228_v53 = vld [vmem:[%s1635_s3 + $0x120] ss:$8 sps:$4 sm:$0xff]   ;;  %v1236_v61 = vld [vmem:[%s1635_s3 + $0x134] ss:$8 sps:$4 sm:$0xff]  }
   0xe   :  { %533 = vmatprep.subr.bf16.mxu1 %v1210_v25  ;;  %v1231_v55 = vld [vmem:[%s1635_s3] ss:$8 sps:$4 sm:$0xff]   ;;  %v1239_v62 = vld [vmem:[%s1635_s3 + $0x14] ss:$8 sps:$4 sm:$0xff]   ;;  %v1234_v63 = vld [vmem:[%s1635_s3 + $0x130] ss:$8 sps:$4 sm:$0xff]  }
   0xf   :  { %1149 = vmatpush3.bf16.msra.mxu0 %v1192_v7  ;;  %v1237_v0 = vld [vmem:[%s1635_s3 + $0x10] ss:$8 sps:$4 sm:$0xff]   ;;  %v1242_v1 = vld [vmem:[%s1635_s3 + $0x144] ss:$8 sps:$4 sm:$0xff]   ;;  %v1240_v6 = vld [vmem:[%s1635_s3 + $0x140] ss:$8 sps:$4 sm:$0xff]  }
  0x10   :  { %246 = vmatprep.subr.bf16.mxu0 %v1197_v12  ;;  %v1245_v2 = vld [vmem:[%s1635_s3 + $0x24] ss:$8 sps:$4 sm:$0xff]   ;;  %v1243_v7 = vld [vmem:[%s1635_s3 + $0x20] ss:$8 sps:$4 sm:$0xff]   ;;  %v1248_v11 = vld [vmem:[%s1635_s3 + $0x154] ss:$8 sps:$4 sm:$0xff]  }
  0x11   :  { %534 = vmatpush1.bf16.msra.mxu1 %v1215_v28  ;;  %v1251_v12 = vld [vmem:[%s1635_s3 + $0x34] ss:$8 sps:$4 sm:$0xff]   ;;  %v1246_v13 = vld [vmem:[%s1635_s3 + $0x150] ss:$8 sps:$4 sm:$0xff]   ;;  %v1252_v19 = vld [vmem:[%s1635_s3 + $0x160] ss:$8 sps:$4 sm:$0xff]  }
  0x12   :  { %1151 = vmatmul.mubr.msk.bf16.vlgmr.msra.gmra.mrb[0].mxu0 %vm66_vm0, %v26_v15  ;;  %535 = vmatprep.subr.bf16.mxu1 %v1216_v29  ;;  %v1254_v15 = vld [vmem:[%s1635_s3 + $0x164] ss:$8 sps:$4 sm:$0xff]   ;;  %v1255_v20 = vld [vmem:[%s1635_s3 + $0x40] ss:$8 sps:$4 sm:$0xff]   ;;  %v1260_v23 = vld [vmem:[%s1635_s3 + $0x174] ss:$8 sps:$4 sm:$0xff]  }
  0x13   :  { %247 = vmatpush1.bf16.msra.mxu0 %v1195_v14  ;;  %278 = vmatprep.mubr.bf16.mxu0 %v1283_v35  ;;  %v1249_v14 = vld [vmem:[%s1635_s3 + $0x30] ss:$8 sps:$4 sm:$0xff]   ;;  %v1263_v24 = vld [vmem:[%s1635_s3 + $0x54] ss:$8 sps:$4 sm:$0xff]  }
  0x14   :  { %248 = vmatprep.subr.bf16.mxu0 %v1203_v16  ;;  %v1257_v16 = vld [vmem:[%s1635_s3 + $0x44] ss:$8 sps:$4 sm:$0xff]   ;;  %v1258_v25 = vld [vmem:[%s1635_s3 + $0x170] ss:$8 sps:$4 sm:$0xff]  }
  0x15   :  { %536 = vmatpush1.bf16.msra.mxu1 %v1221_v32 }
  0x16   :  { %537 = vmatprep.subr.bf16.mxu1 %v1222_v33 }
  0x17   :  { %249 = vmatpush1.bf16.msra.mxu0 %v1201_v17 }
  0x18   :  { %250 = vmatprep.subr.bf16.mxu0 %v1209_v22 }
  0x19   :  { %538 = vmatpush1.bf16.msra.mxu1 %v1227_v37  ;;  %v1267_v37 = vld [vmem:[%s1635_s3 + $0x190] ss:$8 sps:$4 sm:$0xff]  }
  0x1a   :  { %688 = vmatprep.subr.bf16.mxu1 %v1230_v38  ;;  %v1272_v38 = vld [vmem:[%s1635_s3 + $0x1a4] ss:$8 sps:$4 sm:$0xff]  }
  0x1b   :  { %251 = vmatpush1.bf16.msra.mxu0 %v1207_v21 }
  0x1c   :  { %252 = vmatprep.subr.bf16.mxu0 %v1214_v26  ;;  %v1261_v26 = vld [vmem:[%s1635_s3 + $0x50] ss:$8 sps:$4 sm:$0xff]  }
  0x1f   :  { %253 = vmatpush1.bf16.msra.mxu0 %v1212_v27  ;;  %v1266_v27 = vld [vmem:[%s1635_s3 + $0x184] ss:$8 sps:$4 sm:$0xff]  }
  0x20   :  { %254 = vmatprep.subr.bf16.mxu0 %v1220_v31  ;;  %v1264_v31 = vld [vmem:[%s1635_s3 + $0x180] ss:$8 sps:$4 sm:$0xff]  }
  0x23   :  { %255 = vmatpush1.bf16.msra.mxu0 %v1218_v30 }
  0x24   :  { %256 = vmatprep.subr.bf16.mxu0 %v1226_v34 }
  0x27   :  { %257 = vmatpush1.bf16.msra.mxu0 %v1224_v36  ;;  %v1269_v36 = vld [vmem:[%s1635_s3 + $0x194] ss:$8 sps:$4 sm:$0xff]  }
  0x28   :  { %376 = vmatprep.subr.bf16.mxu0 %v1233_v39 }
  0xe5   :  { %v1152_v41 = vpop.f32.mrb[0].mxu0 }
  0xe6   :  { %v116_v42 = vadd.f32 %v1152_v41, %v1006_v40  ;;  %v107_v43 = vpop.f32.mrb[1].mxu0 }
  0xe7   :  { %v108_v44 = vadd.f32 %v1006_v40, %v107_v43  ;;  %v1153_v45 = vpop.f32.mrb[2].mxu0 }
  0xe8   :  { %v124_v46 = vmax.f32 %v116_v42, 0.0  ;;  %v119_v47 = vadd.f32 %v1153_v45, %v1006_v40  ;;  %v110_v48 = vpop.f32.mrb[3].mxu0  ;;  %v1270_v42 = vld [vmem:[%s1635_s3 + $0x1a0] ss:$8 sps:$4 sm:$0xff]  }
  0xe9   :  { %v122_v49 = vmax.f32 %v108_v44, 0.0  ;;  %v111_v50 = vadd.f32 %v1006_v40, %v110_v48  ;;  %v1278_v48 = vld [vmem:[%s1635_s3 + $0x1c4] ss:$8 sps:$4 sm:$0xff]  }
  0xea   :  { %134 = vst.msk [vmem:[#allocation2 + $0x16] sm:$0xff] %vm126_vm1, %v124_v46  ;;  %v125_v51 = vmax.f32 %v119_v47, 0.0  ;;  %v1275_v46 = vld [vmem:[%s1635_s3 + $0x1b4] ss:$8 sps:$4 sm:$0xff]   ;;  %v1273_v47 = vld [vmem:[%s1635_s3 + $0x1b0] ss:$8 sps:$4 sm:$0xff]  }
  0xeb   :  { %132 = vst.msk [vmem:[#allocation2 + $0x2] sm:$0xff] %vm126_vm1, %v122_v49  ;;  %v123_v52 = vmax.f32 %v111_v50, 0.0 }
  0xec   :  { %135 = vst.msk [vmem:[#allocation2 + $0x1e] sm:$0xff] %vm126_vm1, %v125_v51  ;;  %v1276_v51 = vld [vmem:[%s1635_s3 + $0x1c0] ss:$8 sps:$4 sm:$0xff]  }
  0xed   :  { %133 = vst.msk [vmem:[#allocation2 + $0xa] sm:$0xff] %vm126_vm1, %v123_v52 }
  0xf1   :  { %v439_v8 = vld [vmem:[#allocation2 + $0x12] sm:$0xff] }
  0xf2   :  { %v156_v54 = vld [vmem:[#allocation2 + $0x1] sm:$0xff]  ;;  %v600_v43 = vld [vmem:[#allocation2 + $0x13] sm:$0xff] }
  0xf3   :  { %v437_v57 = vld [vmem:[#allocation2 + $0x2] sm:$0xff]  ;;  %v159_v4 = vld [vmem:[#allocation2 + $0x19] sm:$0xff] }
  0xf4   :  { %v157_v56 = vld [vmem:[#allocation2 + $0x9] sm:$0xff]  ;;  %v158_v3 = vld [vmem:[#allocation2 + $0x11] sm:$0xff]  ;;  %v440_v5 = vld [vmem:[#allocation2 + $0x1a] sm:$0xff] }
  0xf5   :  { %v438_v58 = vld [vmem:[#allocation2 + $0xa] sm:$0xff]  ;;  %v161_v59 = vpack.c.bf16 %v157_v56, %v156_v54  ;;  %v162_v9 = vpack.c.bf16 %v159_v4, %v158_v3  ;;  %v443_v10 = vpack.c.bf16 %v440_v5, %v439_v8  ;;  %v160_v17 = vld [vmem:[#allocation2 + $0x21] sm:$0xf]  ;;  %v139_v40 = vld [vmem:[#allocation2 + $0x18] sm:$0xff] }
  0xf6   :  { %v442_v60 = vpack.c.bf16 %v438_v58, %v437_v57  ;;  %v441_v18 = vld [vmem:[#allocation2 + $0x22] sm:$0xf]  ;;  %v163_v21 = vpack.c.bf16 %v160_v17, %v160_v17  ;;  %v137_v28 = vld [vmem:[#allocation2 + $0x8] sm:$0xff]  ;;  %v138_v39 = vld [vmem:[#allocation2 + $0x10] sm:$0xff] }
  0xf7   :  { %1037 = vmatmul.mubr.msk.bf16.vlgmr.msra.gmra.mrb[4].mxu0 %vm126_vm1, %v161_v59  ;;  %v444_v22 = vpack.c.bf16 %v441_v18, %v441_v18  ;;  %v598_v29 = vld [vmem:[#allocation2 + $0x3] sm:$0xff]  ;;  %v599_v30 = vld [vmem:[#allocation2 + $0xb] sm:$0xff]  ;;  %v601_v41 = vld [vmem:[#allocation2 + $0x1b] sm:$0xff]  ;;  %v142_v44 = vpack.c.bf16 %v139_v40, %v138_v39 }
  0xf8   :  { %1079 = vmatmul.mubr.msk.bf16.vlgmr.msra.gmra.mrb[0].mxu1 %vm126_vm1, %v442_v60  ;;  %377 = vmatpush1.bf16.msra.mxu0 %v1231_v55  ;;  %v136_v32 = vld [vmem:[#allocation2] sm:$0xff]  ;;  %v603_v34 = vpack.c.bf16 %v599_v30, %v598_v29  ;;  %v604_v45 = vpack.c.bf16 %v601_v41, %v600_v43  ;;  %v1281_v54 = vld [vmem:[%s1635_s3 + $0x1d4] ss:$8 sps:$4 sm:$0xff]   ;;  %v1279_v55 = vld [vmem:[%s1635_s3 + $0x1d0] ss:$8 sps:$4 sm:$0xff]  }
  0xf9   :  { %689 = vmatpush1.bf16.msra.mxu1 %v1228_v53  ;;  %378 = vmatprep.subr.bf16.mxu0 %v1239_v62  ;;  %v141_v33 = vpack.c.bf16 %v137_v28, %v136_v32  ;;  %v140_v49 = vld [vmem:[#allocation2 + $0x20] sm:$0xf]  ;;  %v759_v56 = vld [vmem:[#allocation2 + $0x4] sm:$0xff]  ;;  %v760_v57 = vld [vmem:[#allocation2 + $0xc] sm:$0xff] }
  0xfa   :  { %690 = vmatprep.subr.bf16.mxu1 %v1236_v61  ;;  %288 = vmatprep.mubr.bf16.mxu0 %v1283_v35  ;;  %v602_v50 = vld [vmem:[#allocation2 + $0x23] sm:$0xf]  ;;  %v143_v52 = vpack.c.bf16 %v140_v49, %v140_v49  ;;  %v764_v58 = vpack.c.bf16 %v760_v57, %v759_v56  ;;  %v761_v60 = vld [vmem:[#allocation2 + $0x14] sm:$0xff]  ;;  %v920_v30 = vld [vmem:[%s1637_s4] sm:$0x3] }
  0xfb   :  { %569 = vmatprep.mubr.bf16.mxu1 %v1283_v35  ;;  %v605_v53 = vpack.c.bf16 %v602_v50, %v602_v50  ;;  %v762_v59 = vld [vmem:[#allocation2 + $0x1c] sm:$0xff]  ;;  %v763_v62 = vld [vmem:[#allocation2 + $0x24] sm:$0xf] }
  0xfc   :  { %379 = vmatpush1.bf16.msra.mxu0 %v1237_v0  ;;  %v765_v61 = vpack.c.bf16 %v762_v59, %v761_v60 }
  0xfd   :  { %691 = vmatpush1.bf16.msra.mxu1 %v1234_v63  ;;  %380 = vmatprep.subr.bf16.mxu0 %v1245_v2  ;;  %v766_v63 = vpack.c.bf16 %v763_v62, %v763_v62 }
  0xfe   :  { %692 = vmatprep.subr.bf16.mxu1 %v1242_v1 }
  0xff   :  { %1038 = vmatmul.mubr.msk.bf16.gmra.mrb[8].mxu0 %vm126_vm1, %v162_v9 }
 0x100   :  { %1080 = vmatmul.mubr.msk.bf16.gmra.mrb[4].mxu1 %vm126_vm1, %v443_v10  ;;  %381 = vmatpush1.bf16.msra.mxu0 %v1243_v7 }
 0x101   :  { %693 = vmatpush1.bf16.msra.mxu1 %v1240_v6  ;;  %382 = vmatprep.subr.bf16.mxu0 %v1251_v12 }
 0x102   :  { %694 = vmatprep.subr.bf16.mxu1 %v1248_v11  ;;  %298 = vmatprep.mubr.bf16.mxu0 %v1283_v35 }
 0x103   :  { %579 = vmatprep.mubr.bf16.mxu1 %v1283_v35 }
 0x104   :  { %383 = vmatpush1.bf16.msra.mxu0 %v1249_v14 }
 0x105   :  { %695 = vmatpush1.bf16.msra.mxu1 %v1246_v13  ;;  %384 = vmatprep.subr.bf16.mxu0 %v1257_v16 }
 0x106   :  { %696 = vmatprep.subr.bf16.mxu1 %v1254_v15  ;;  %v922_v15 = vlaneseq }
 0x107   :  { %1039 = vmatmul.mubr.msk.bf16.gmra.mrb[12].mxu0 %vm126_vm1, %v163_v21 }
 0x108   :  { %1081 = vmatmul.mubr.msk.bf16.gmra.mrb[8].mxu1 %vm126_vm1, %v444_v22  ;;  %385 = vmatpush1.bf16.msra.mxu0 %v1255_v20  ;;  %v923_v16 = vshrl.u32 %v922_v15, 7 }
 0x109   :  { %697 = vmatpush1.bf16.msra.mxu1 %v1252_v19  ;;  %386 = vmatprep.subr.bf16.mxu0 %v1263_v24 }
 0x10a   :  { %698 = vmatprep.subr.bf16.mxu1 %v1260_v23  ;;  %408 = vmatprep.mubr.bf16.mxu0 %v1283_v35  ;;  %v924_v28 = vsub.s32 0, %v923_v16 }
 0x10b   :  { %720 = vmatprep.mubr.bf16.mxu1 %v1283_v35 }
 0x10c   :  { %387 = vmatpush1.bf16.msra.mxu0 %v1261_v26 }
 0x10d   :  { %699 = vmatpush1.bf16.msra.mxu1 %v1258_v25 }
 0x10e   :  { %849 = vmatprep.subr.bf16.mxu1 %v1266_v27 }
 0x10f   :  { %1052 = vmatmul.mubr.msk.bf16.vlgmr.msra.gmra.mrb[4].mxu0 %vm126_vm1, %v141_v33 }
 0x110   :  { %1106 = vmatmul.mubr.msk.bf16.vlgmr.msra.gmra.mrb[0].mxu1 %vm126_vm1, %v603_v34  ;;  %418 = vmatprep.mubr.bf16.mxu0 %v1283_v35  ;;  %v925_v34 = vrot.slane %v920_v30, %v924_v28 }
 0x111   :  { %850 = vmatpush1.bf16.msra.mxu1 %v1264_v31  ;;  %730 = vmatprep.mubr.bf16.mxu1 %v1283_v35  ;;  %v928_v31 = vsub.s32 1, %v923_v16 }
 0x112   :  { %851 = vmatprep.subr.bf16.mxu1 %v1269_v36 }
 0x115   :  { %852 = vmatpush1.bf16.msra.mxu1 %v1267_v37  ;;  %v929_v37 = vrot.slane %v920_v30, %v928_v31 }
 0x116   :  { %853 = vmatprep.subr.bf16.mxu1 %v1272_v38 }
 0x117   :  { %1053 = vmatmul.mubr.msk.bf16.gmra.mrb[8].mxu0 %vm126_vm1, %v142_v44 }
 0x118   :  { %1107 = vmatmul.mubr.msk.bf16.gmra.mrb[4].mxu1 %vm126_vm1, %v604_v45  ;;  %428 = vmatprep.mubr.bf16.mxu0 %v1283_v35 }
 0x119   :  { %854 = vmatpush1.bf16.msra.mxu1 %v1270_v42  ;;  %740 = vmatprep.mubr.bf16.mxu1 %v1283_v35  ;;  %v986_v42 = vpop.permute.xlu0 %985 }
 0x11a   :  { %855 = vmatprep.subr.bf16.mxu1 %v1275_v46 }
 0x11d   :  { %856 = vmatpush1.bf16.msra.mxu1 %v1273_v47 }
 0x11e   :  { %857 = vmatprep.subr.bf16.mxu1 %v1278_v48 }
 0x11f   :  { %1054 = vmatmul.mubr.msk.bf16.gmra.mrb[16].mxu0 %vm126_vm1, %v143_v52 }
 0x120   :  { %1108 = vmatmul.mubr.msk.bf16.gmra.mrb[12].mxu1 %vm126_vm1, %v605_v53 }
 0x121   :  { %858 = vmatpush1.bf16.msra.mxu1 %v1276_v51  ;;  %881 = vmatprep.mubr.bf16.mxu1 %v1283_v35 }
 0x122   :  { %859 = vmatprep.subr.bf16.mxu1 %v1281_v54 }
 0x125   :  { %860 = vmatpush1.bf16.msra.mxu1 %v1279_v55  ;;  %v988_v55 = vpop.permute.xlu0 %987 }
 0x128   :  { %1133 = vmatmul.mubr.msk.bf16.vlgmr.msra.gmra.mrb[0].mxu1 %vm126_vm1, %v764_v58 }
 0x129   :  { %891 = vmatprep.mubr.bf16.mxu1 %v1283_v35 }
 0x130   :  { %1134 = vmatmul.mubr.msk.bf16.gmra.mrb[4].mxu1 %vm126_vm1, %v765_v61 }
 0x131   :  { %901 = vmatprep.mubr.bf16.mxu1 %v1283_v35 }
 0x138   :  { %1135 = vmatmul.mubr.msk.bf16.gmra.mrb[16].mxu1 %vm126_vm1, %v766_v63 }
 0x1da   :  { %v300_v0 = vpop.f32.mrb[12].mxu0 }
 0x1db   :  { %v581_v1 = vpop.f32.mrb[8].mxu1  ;;  %v302_v2 = vpop.f32.mrb[13].mxu0 }
 0x1dc   :  { %v583_v3 = vpop.f32.mrb[9].mxu1  ;;  %v304_v4 = vpop.f32.mrb[14].mxu0 }
 0x1dd   :  { %v585_v5 = vpop.f32.mrb[10].mxu1  ;;  %v305_v6 = vpop.f32.mrb[15].mxu0 }
 0x1de   :  { %v586_v7 = vpop.f32.mrb[11].mxu1 }
 0x1e2   :  { %v410_v8 = vpop.f32.mrb[4].mxu0 }
 0x1e3   :  { %v412_v9 = vpop.f32.mrb[5].mxu0 }
 0x1e4   :  { %v414_v10 = vpop.f32.mrb[6].mxu0 }
 0x1e5   :  { %v416_v11 = vpop.f32.mrb[7].mxu0 }
 0x1ea   :  { %v420_v12 = vpop.f32.mrb[8].mxu0 }
 0x1eb   :  { %v422_v13 = vpop.f32.mrb[9].mxu0 }
 0x1ec   :  { %v424_v14 = vpop.f32.mrb[10].mxu0 }
 0x1ed   :  { %v426_v35 = vpop.f32.mrb[11].mxu0 }
 0x1f2   :  { %v430_v17 = vpop.f32.mrb[16].mxu0 }
 0x1f3   :  { %v742_v18 = vpop.f32.mrb[12].mxu1  ;;  %v431_v19 = vadd.f32 %v430_v17, %v300_v0  ;;  %v432_v20 = vpop.f32.mrb[17].mxu0 }
 0x1f4   :  { %v744_v21 = vpop.f32.mrb[13].mxu1  ;;  %v433_v22 = vadd.f32 %v432_v20, %v302_v2  ;;  %v434_v23 = vpop.f32.mrb[18].mxu0 }
 0x1f5   :  { %v746_v24 = vpop.f32.mrb[14].mxu1  ;;  %v596_v25 = vadd.f32 %v581_v1, %v431_v19  ;;  %v435_v26 = vpop.f32.mrb[19].mxu0 }
 0x1f6   :  { %v747_v27 = vpop.f32.mrb[15].mxu1  ;;  %v597_v29 = vadd.f32 %v583_v3, %v433_v22 }
 0x1f7   :  { %v757_v32 = vadd.f32 %v742_v18, %v596_v25  ;;  %v990_v18 = vpop.permute.xlu1 %989 }
 0x1f8   :  { %v758_v33 = vadd.f32 %v744_v21, %v597_v29 }
 0x1fb   :  { %v883_v36 = vpop.f32.mrb[0].mxu1  ;;  %v992_v26 = vpop.permute.xlu1 %991 }
 0x1fc   :  { %v1154_v38 = vadd.f32 %v883_v36, %v410_v8  ;;  %v885_v39 = vpop.f32.mrb[1].mxu1 }
 0x1fd   :  { %v1155_v40 = vadd.f32 %v885_v39, %v412_v9  ;;  %v887_v41 = vpop.f32.mrb[2].mxu1 }
 0x1fe   :  { %v932_v43 = vadd.f32 %v1154_v38, %v925_v34  ;;  %v1156_v44 = vadd.f32 %v887_v41, %v414_v10  ;;  %v889_v45 = vpop.f32.mrb[3].mxu1 }
 0x1ff   :  { %v933_v46 = vadd.f32 %v1155_v40, %v929_v37  ;;  %v1157_v47 = vadd.f32 %v889_v45, %v416_v11 }
 0x200   :  { %v942_v48 = vmax.f32 %v932_v43, 0.0  ;;  %v934_v49 = vadd.f32 %v1156_v44, %v925_v34 }
 0x201   :  { %v943_v50 = vmax.f32 %v933_v46, 0.0  ;;  %v935_v51 = vadd.f32 %v1157_v47, %v929_v37 }
 0x202   :  { %952 = vst [vmem:[%s1638_s5] sm:$0xff] %v942_v48  ;;  %v944_v52 = vmax.f32 %v934_v49, 0.0 }
 0x203   :  { %953 = vst.msk [vmem:[%s1638_s5 + $0x8] sm:$0xff] %vm66_vm0, %v943_v50  ;;  %v945_v53 = vmax.f32 %v935_v51, 0.0  ;;  %v893_v54 = vpop.f32.mrb[4].mxu1 }
 0x204   :  { %954 = vst [vmem:[%s1638_s5 + $0x10] sm:$0xff] %v944_v52  ;;  %v1158_v56 = vadd.f32 %v893_v54, %v420_v12  ;;  %v895_v57 = vpop.f32.mrb[5].mxu1  ;;  %998 = vst.msk [vmem:[%s1638_s5 + $0x8] sm:$0xff] %vm997_vm2, %v986_v42 }
 0x205   :  { %955 = vst.msk [vmem:[%s1638_s5 + $0x18] sm:$0xff] %vm66_vm0, %v945_v53  ;;  %v1159_v58 = vadd.f32 %v895_v57, %v422_v13  ;;  %v897_v59 = vpop.f32.mrb[6].mxu1 }
 0x206   :  { %v936_v60 = vadd.f32 %v1158_v56, %v925_v34  ;;  %v1160_v61 = vadd.f32 %v897_v59, %v424_v14  ;;  %v899_v62 = vpop.f32.mrb[7].mxu1  ;;  %999 = vst.msk [vmem:[%s1638_s5 + $0x18] sm:$0xff] %vm997_vm2, %v988_v55 }
 0x207   :  { %v937_v63 = vadd.f32 %v1159_v58, %v929_v37  ;;  %v1161_v0 = vadd.f32 %v899_v62, %v426_v35 }
 0x208   :  { %v946_v1 = vmax.f32 %v936_v60, 0.0  ;;  %v938_v2 = vadd.f32 %v1160_v61, %v925_v34 }
 0x209   :  { %v947_v3 = vmax.f32 %v937_v63, 0.0  ;;  %v939_v4 = vadd.f32 %v1161_v0, %v929_v37 }
 0x20a   :  { %v948_v5 = vmax.f32 %v938_v2, 0.0  ;;  %v963_v8 = vrot.slane %v946_v1, 4 }
 0x20b   :  { %v949_v6 = vmax.f32 %v939_v4, 0.0  ;;  %v903_v7 = vpop.f32.mrb[16].mxu1  ;;  %v966_v12 = vrot.slane %v947_v3, 4 }
 0x20c   :  { %v964_v9 = vrot.slane %v948_v5, 4  ;;  %v918_v10 = vadd.f32 %v903_v7, %v757_v32  ;;  %v905_v11 = vpop.f32.mrb[17].mxu1 }
 0x20d   :  { %v967_v13 = vrot.slane %v949_v6, 4  ;;  %v919_v14 = vadd.f32 %v905_v11, %v758_v33  ;;  %v907_v15 = vpop.f32.mrb[18].mxu1 }
 0x20e   :  { %v965_v16 = vsel %vm962_vm3, %v963_v8, %v964_v9  ;;  %v940_v17 = vadd.f32 %v925_v34, %v918_v10  ;;  %v908_v35 = vpop.f32.mrb[19].mxu1 }
 0x20f   :  { %977 = vst [vmem:[%s1638_s5 + $0x20] sm:$0xff] %v965_v16  ;;  %v968_v19 = vsel %vm962_vm3, %v966_v12, %v967_v13  ;;  %v941_v20 = vadd.f32 %v929_v37, %v919_v14 }
 0x210   :  { %978 = vst.msk [vmem:[%s1638_s5 + $0x28] sm:$0xff] %vm66_vm0, %v968_v19  ;;  %v950_v21 = vmax.f32 %v940_v17, 0.0 }
 0x211   :  { %v951_v22 = vmax.f32 %v941_v20, 0.0  ;;  %1000 = vst.msk [vmem:[%s1638_s5 + $0x28] sm:$0xff] %vm997_vm2, %v990_v18 }
 0x212   :  { %v969_v23 = vrot.slane %v950_v21, 4 }
 0x213   :  { %v971_v24 = vrot.slane %v951_v22, 4 }
 0x214   :  { %v970_v25 = vsel %vm962_vm3, %v964_v9, %v969_v23 }
 0x215   :  { %979 = vst [vmem:[%s1638_s5 + $0x30] sm:$0xff] %v970_v25  ;;  %v972_v27 = vsel %vm962_vm3, %v967_v13, %v971_v24 }
 0x216   :  { %980 = vst.msk [vmem:[%s1638_s5 + $0x38] sm:$0xff] %vm66_vm0, %v972_v27 }
 0x217   :  { %1001 = vst.msk [vmem:[%s1638_s5 + $0x38] sm:$0xff] %vm997_vm2, %v992_v26 }

</bundles_post_ra>
